<compile_context>
chip_gen: v5e
topology: v5e:2x2
jax: 0.10.0
libtpu: 0.0.40
codegen_flags: <defaults>
</compile_context>

<pallas_src>
import jax
import jax.numpy as jnp
from jax.experimental import pallas as pl
from jax.experimental.pallas import tpu as pltpu


def _round_up(v, m):
    return ((v + m - 1) // m) * m


def _cdiv(a, b):
    return (a + b - 1) // b


def _tpu_params():
    """(vmem_bytes, tensorcores_per_chip, streamed-path row-tile roofline)."""
    kind = ""
    try:
        kind = jax.devices()[0].device_kind.lower()
    except Exception:
        pass
    if "v7" in kind or "7x" in kind:
        vmem, tcs, tm_roof = 64 * 1024 * 1024, 2, 384
    elif "v6" in kind:
        vmem, tcs, tm_roof = 128 * 1024 * 1024, 1, 768
    elif "v5p" in kind:
        vmem, tcs, tm_roof = 128 * 1024 * 1024, 2, 512
    elif "v5" in kind:
        vmem, tcs, tm_roof = 128 * 1024 * 1024, 1, 256
    elif "v4" in kind:
        vmem, tcs, tm_roof = 128 * 1024 * 1024, 2, 256
    else:
        vmem, tcs, tm_roof = 64 * 1024 * 1024, 1, 512
    try:
        info = pltpu.get_tpu_info()
        vmem = int(getattr(info, "vmem_capacity_bytes", vmem)) or vmem
    except Exception:
        pass
    return vmem, tcs, tm_roof


def _make_kernel(nc1, nj, tc1):
    def kernel(x_ref, w1_ref, b1_ref, w2_ref, b2_ref, o_ref, h_ref):
        # grid = (i row tiles, c phase steps).  c < nc1 : hidden-activation
        # column chunk c into persistent h_ref; c >= nc1 : output column tile
        # (c - nc1) from the full h_ref.
        # NOTE: correctness of the persistent h_ref scratch requires axis 1 to
        # remain the innermost, sequential ("arbitrary") grid axis.
        c = pl.program_id(1)

        @pl.when(c < nc1)
        def _layer1():
            cc = jnp.minimum(c, nc1 - 1)           # clamp (branch-guarded anyway)
            x = x_ref[...]
            if x.dtype != w1_ref.dtype:
                x = x.astype(w1_ref.dtype)
            h = jnp.dot(x, w1_ref[...], preferred_element_type=jnp.float32)
            h = jnp.maximum(h + b1_ref[cc], 0.0)   # bias + ReLU in f32
            h_ref[cc] = h.astype(h_ref.dtype)

        @pl.when(c >= nc1)
        def _layer2():
            jj = jnp.maximum(c - nc1, 0)           # clamp (branch-guarded anyway)
            acc = jnp.dot(h_ref[0], w2_ref[pl.ds(0, tc1), :],
                          preferred_element_type=jnp.float32)
            for k in range(1, nc1):                # static unroll over hidden chunks
                acc = acc + jnp.dot(h_ref[k], w2_ref[pl.ds(k * tc1, tc1), :],
                                    preferred_element_type=jnp.float32)
            acc = jnp.maximum(acc + b2_ref[jj], 0.0)
            o_ref[...] = acc.astype(o_ref.dtype)

    return kernel


def transform_module_pallas(x, w1, b1, w2, b2, *, mxu_dtype=jnp.bfloat16,
                            max_resident_bytes=None):
    """Pallas equivalent of TransformModule.forward.

    x      : (B, C, H, W)
    w1, w2 : (D, D) PyTorch Linear weights (out_features, in_features), D = H*W
    b1, b2 : (D,)
    mxu_dtype : MXU operand dtype (bf16 recommended); None keeps x.dtype.
                Accumulation / bias / ReLU are always f32.  Use
                mxu_dtype=jnp.float32 for bit-faithful f32 semantics.
    """
    B, C, H, W = x.shape
    D = H * W
    M = B * C

    compute_dtype = jnp.dtype(x.dtype) if mxu_dtype is None else jnp.dtype(mxu_dtype)
    c_isz = compute_dtype.itemsize
    x_isz = jnp.dtype(x.dtype).itemsize
    o_isz = x_isz
    h_isz = c_isz
    # TODO(synk): optionally keep the hidden activation in f32 on the bf16 path
    # (removes one rounding step vs. the f32 reference at the cost of a slower
    # f32 layer-2 matmul).

    Dp = _round_up(D, 128)                       # lane-aligned feature width

    vmem_cap, tcs, tm_roof = _tpu_params()
    vmem_limit = min(int(0.92 * vmem_cap), 128 * 1024 * 1024)
    budget = int(0.80 * vmem_limit)
    if max_resident_bytes is not None:
        budget = min(budget, int(max_resident_bytes))

    Mr = M if M < 8 else _round_up(M, 8)

    # ---- layer-1 weight: resident vs column-streamed ------------------------
    w1_bytes = Dp * Dp * c_isz
    if w1_bytes <= budget // 3:
        nc1, tc1 = 1, Dp
    else:
        tc1 = max(128, ((budget // 3) // (2 * Dp * c_isz)) // 128 * 128)
        tc1 = min(tc1, Dp)
        nc1 = _cdiv(Dp, tc1)
        tc1 = min(Dp, _round_up(_cdiv(Dp, nc1), 128))  # balance chunk widths
        nc1 = _cdiv(Dp, tc1)
    Dh = nc1 * tc1                                # (possibly padded) hidden width

    def _vmem_cost(tm_, tn_, nj_):
        ni_ = _cdiv(M, tm_)
        x_bufs = 1 if ni_ == 1 else (3 if (nc1 + nj_) <= 4 else 2)
        w1_bufs = 1 if nc1 == 1 else 2
        w2_bufs = 1 if nj_ == 1 else 3
        cost = x_bufs * tm_ * Dp * x_isz
        cost += w1_bufs * Dp * tc1 * c_isz
        cost += w2_bufs * Dh * tn_ * c_isz
        cost += 2 * tm_ * tn_ * o_isz
        cost += nc1 * tm_ * tc1 * h_isz                    # h scratch
        cost += (nc1 * tc1 + nj_ * tn_) * 8 * 4            # biases (sublane pad)
        # headroom for Mosaic intermediates: f32 layer results + x cast copy
        cost += tm_ * max(tc1, tn_) * 4 + tm_ * tn_ * 4
        if compute_dtype != jnp.dtype(x.dtype):
            cost += tm_ * Dp * c_isz
        return cost

    # ---- layer-2 weight: resident vs column-streamed; pick tn ---------------
    tm_res_probe = Mr if M < 8 else min(256, Mr)
    if _vmem_cost(tm_res_probe, Dp, 1) <= budget:
        nj, tn = 1, Dp            # fully resident: each weight read exactly once
    else:
        tm_probe = Mr if M < 8 else min(max(tm_roof, 256), Mr)
        tn = 128
        cand = min(Dp, 2048)
        while cand >= 128:
            if _vmem_cost(tm_probe, cand, _cdiv(Dp, cand)) <= budget:
                tn = cand
                break
            cand -= 128
        nj = _cdiv(Dp, tn)
    Dn = nj * tn                                  # (possibly padded) output width

    # ---- row tile: fill leftover VMEM (fewer W2 re-streams on streamed path)
    if M < 8:
        tm = M
    else:
        tm_cap = min(Mr, 2048 if (nj > 1 or nc1 > 1) else 512)
        tm = 8
        t = tm_cap
        while t >= 8:
            if _vmem_cost(t, tn, nj) <= budget:
                tm = t
                break
            t -= 8
        # On multi-TensorCore parts only split rows across cores when each
        # half still feeds the MXU well (>= 256 rows).
        if tcs >= 2 and M >= 512 and _cdiv(M, tm) < 2:
            tm = _round_up(_cdiv(M, 2), 8)
    ni = _cdiv(M, tm)

    # ---- operand preparation (zero-padding preserves semantics) -------------
    x_flat = x.reshape(M, D)
    if Dp != D:
        x_flat = jnp.pad(x_flat, ((0, 0), (0, Dp - D)))

    w1_t = w1.T.astype(compute_dtype)                       # x @ w1^T
    if (Dp, Dh) != (D, D):
        w1_t = jnp.pad(w1_t, ((0, Dp - D), (0, Dh - D)))
    w1_c = w1_t.reshape(Dp, nc1, tc1).transpose(1, 0, 2)    # (nc1, Dp, tc1)

    b1_p = b1.astype(jnp.float32)
    if Dh != D:
        b1_p = jnp.pad(b1_p, (0, Dh - D))
    b1_c = b1_p.reshape(nc1, 1, tc1)

    w2_t = w2.T.astype(compute_dtype)
    if (Dh, Dn) != (D, D):
        w2_t = jnp.pad(w2_t, ((0, Dh - D), (0, Dn - D)))    # (Dh, Dn)

    b2_p = b2.astype(jnp.float32)
    if Dn != D:
        b2_p = jnp.pad(b2_p, (0, Dn - D))
    b2_c = b2_p.reshape(nj, 1, tn)

    # ---- BlockSpecs ----------------------------------------------------------
    x_bufs = 1 if ni == 1 else (3 if (nc1 + nj) <= 4 else 2)
    if ni == 1:
        x_spec = pl.BlockSpec((tm, Dp), lambda i, c: (0, 0),
                              pipeline_mode=pl.Buffered(1))
    else:
        x_spec = pl.BlockSpec((tm, Dp), lambda i, c: (i, 0),
                              pipeline_mode=pl.Buffered(x_bufs))

    if nc1 == 1:
        w1_spec = pl.BlockSpec((None, Dp, tc1), lambda i, c: (0, 0, 0),
                               pipeline_mode=pl.Buffered(1))
    else:
        w1_spec = pl.BlockSpec((None, Dp, tc1),
                               lambda i, c: (jnp.minimum(c, nc1 - 1), 0, 0))

    b1_spec = pl.BlockSpec((nc1, 1, tc1), lambda i, c: (0, 0, 0),
                           pipeline_mode=pl.Buffered(1))

    if nj == 1:
        w2_spec = pl.BlockSpec((Dh, tn), lambda i, c: (0, 0),
                               pipeline_mode=pl.Buffered(1))
        out_spec = pl.BlockSpec((tm, tn), lambda i, c: (i, 0))
    else:
        w2_spec = pl.BlockSpec((Dh, tn),
                               lambda i, c: (0, jnp.maximum(c - nc1, 0)),
                               pipeline_mode=pl.Buffered(3))
        out_spec = pl.BlockSpec((tm, tn),
                                lambda i, c: (i, jnp.maximum(c - nc1, 0)))

    b2_spec = pl.BlockSpec((nj, 1, tn), lambda i, c: (0, 0, 0),
                           pipeline_mode=pl.Buffered(1))

    grid = (ni, nc1 + nj)

    w1_reads = 1 if nc1 == 1 else ni
    w2_reads = 1 if nj == 1 else ni
    cost = pl.CostEstimate(
        flops=2 * M * Dp * Dh + 2 * M * Dh * Dn,
        transcendentals=0,
        bytes_accessed=(M * Dp * x_isz + M * Dn * o_isz
                        + w1_reads * Dp * Dh * c_isz
                        + w2_reads * Dh * Dn * c_isz
                        + (Dh + Dn) * 4),
    )

    out_flat = pl.pallas_call(
        _make_kernel(nc1, nj, tc1),
        out_shape=jax.ShapeDtypeStruct((M, Dn), x.dtype),
        grid_spec=pltpu.PrefetchScalarGridSpec(
            num_scalar_prefetch=0,
            grid=grid,
            in_specs=[x_spec, w1_spec, b1_spec, w2_spec, b2_spec],
            out_specs=out_spec,
            scratch_shapes=[pltpu.VMEM((nc1, tm, tc1), compute_dtype)],
        ),
        compiler_params=pltpu.CompilerParams(
            dimension_semantics=("parallel", "arbitrary"),
            vmem_limit_bytes=vmem_limit,
        ),
        cost_estimate=cost,
    )(x_flat, w1_c, b1_c, w2_t, b2_c)

    out = out_flat[:, :D] if Dn != D else out_flat
    return out.reshape(B, C, H, W)


def _reference(x, w1, b1, w2, b2):
    B, C, H, W = x.shape
    xf = x.reshape(B, C, H * W)
    h = jnp.maximum(jnp.einsum("bcd,od->bco", xf, w1) + b1, 0.0)
    o = jnp.maximum(jnp.einsum("bcd,od->bco", h, w2) + b2, 0.0)
    return o.reshape(B, C, H, W)


if __name__ == "__main__":
    # ---- case 1: B=2, C=4, H=W=16 (D=256, multiple of 128) -------------------
    B, C, H, W = 2, 4, 16, 16
    D = H * W
    kx, kw1, kb1, kw2, kb2 = jax.random.split(jax.random.PRNGKey(0), 5)
    x = jax.random.normal(kx, (B, C, H, W), dtype=jnp.float32)
    bound = 1.0 / (D ** 0.5)   # mimic nn.Linear's uniform(-1/sqrt(D), 1/sqrt(D))
    w1 = jax.random.uniform(kw1, (D, D), jnp.float32, -bound, bound)
    b1 = jax.random.uniform(kb1, (D,), jnp.float32, -bound, bound)
    w2 = jax.random.uniform(kw2, (D, D), jnp.float32, -bound, bound)
    b2 = jax.random.uniform(kb2, (D,), jnp.float32, -bound, bound)
    ref = _reference(x, w1, b1, w2, b2)

    # exact-semantics path: f32 MXU operands, fully resident weights
    out_f32 = jax.block_until_ready(
        transform_module_pallas(x, w1, b1, w2, b2, mxu_dtype=jnp.float32))
    assert out_f32.shape == (B, C, H, W)
    assert jnp.allclose(out_f32, ref, atol=1e-4, rtol=1e-4)

    # default fast path: bf16 MXU operands, f32 accumulation
    out_bf16 = jax.block_until_ready(transform_module_pallas(x, w1, b1, w2, b2))
    assert jnp.allclose(out_bf16, ref, atol=5e-2, rtol=5e-2)

    # forced weight-streaming path (tiny budget -> both W1 and W2 column-streamed,
    # exercising the large-D / v7x 64 MiB code path)
    out_stream = jax.block_until_ready(
        transform_module_pallas(x, w1, b1, w2, b2, mxu_dtype=jnp.float32,
                                max_resident_bytes=200 * 1024))
    assert jnp.allclose(out_stream, ref, atol=1e-4, rtol=1e-4)

    # ---- case 2: non-128-multiple D and M < 8 (padding + tiny-row path) ------
    B2, C2, H2, W2 = 1, 3, 12, 12
    D2 = H2 * W2
    k2 = jax.random.split(jax.random.PRNGKey(1), 5)
    x2 = jax.random.normal(k2[0], (B2, C2, H2, W2), dtype=jnp.float32)
    bound2 = 1.0 / (D2 ** 0.5)
    w1b = jax.random.uniform(k2[1], (D2, D2), jnp.float32, -bound2, bound2)
    b1b = jax.random.uniform(k2[2], (D2,), jnp.float32, -bound2, bound2)
    w2b = jax.random.uniform(k2[3], (D2, D2), jnp.float32, -bound2, bound2)
    b2b = jax.random.uniform(k2[4], (D2,), jnp.float32, -bound2, bound2)
    ref2 = _reference(x2, w1b, b1b, w2b, b2b)
    out2 = jax.block_until_ready(
        transform_module_pallas(x2, w1b, b1b, w2b, b2b, mxu_dtype=jnp.float32))
    assert out2.shape == (B2, C2, H2, W2)
    assert jnp.allclose(out2, ref2, atol=1e-4, rtol=1e-4)

    print("KERNEL_OK")
</pallas_src>

<mosaic_0001>
module attributes {stable_mosaic.version = 11 : i64} {
  func.func @kernel(%arg0: i32, %arg1: i32, %arg2: memref<8x256xf32, #tpu.memory_space<vmem>>, %arg3: memref<1x256x256xf32, #tpu.memory_space<vmem>>, %arg4: memref<1x1x256xf32, #tpu.memory_space<vmem>>, %arg5: memref<256x256xf32, #tpu.memory_space<vmem>>, %arg6: memref<1x1x256xf32, #tpu.memory_space<vmem>>, %arg7: memref<8x256xf32, #tpu.memory_space<vmem>>, %arg8: memref<1x8x256xf32, #tpu.memory_space<vmem>>) attributes {dimension_semantics = [#tpu.dimension_semantics<parallel>, #tpu.dimension_semantics<arbitrary>], iteration_bounds = array<i64: 1, 2>, scalar_prefetch = 0 : i64, scratch_operands = 1 : i64, tpu.core_type = #tpu.core_type<tc>, window_params = [{pipeline_mode = #tpu.pipeline_mode<synchronous>, transform_indices = @transform_0, window_bounds = array<i64: 8, 256>}, {pipeline_mode = #tpu.pipeline_mode<synchronous>, transform_indices = @transform_1, window_bounds = array<i64: 1, 256, 256>}, {pipeline_mode = #tpu.pipeline_mode<synchronous>, transform_indices = @transform_2, window_bounds = array<i64: 1, 1, 256>}, {pipeline_mode = #tpu.pipeline_mode<synchronous>, transform_indices = @transform_3, window_bounds = array<i64: 256, 256>}, {pipeline_mode = #tpu.pipeline_mode<synchronous>, transform_indices = @transform_4, window_bounds = array<i64: 1, 1, 256>}, {transform_indices = @transform_5, window_bounds = array<i64: 8, 256>}]} {
    %c1_i32 = arith.constant 1 : i32
    %0 = arith.cmpi slt, %arg1, %c1_i32 : i32
    %1 = arith.extui %0 : i1 to i32
    %c0_i32 = arith.constant 0 : i32
    %2 = arith.cmpi ne, %1, %c0_i32 : i32
    scf.if %2 {
      %c0_i32_2 = arith.constant 0 : i32
      %6 = arith.minsi %arg1, %c0_i32_2 : i32
      %c0 = arith.constant 0 : index
      %c0_3 = arith.constant 0 : index
      %7 = vector.load %arg2[%c0, %c0_3] : memref<8x256xf32, #tpu.memory_space<vmem>>, vector<8x256xf32>
      %c0_4 = arith.constant 0 : index
      %c0_5 = arith.constant 0 : index
      %c0_6 = arith.constant 0 : index
      %8 = vector.load %arg3[%c0_4, %c0_5, %c0_6] : memref<1x256x256xf32, #tpu.memory_space<vmem>>, vector<1x256x256xf32>
      %9 = vector.shape_cast %8 : vector<1x256x256xf32> to vector<256x256xf32>
      %cst = arith.constant dense<0.000000e+00> : vector<8x256xf32>
      %10 = tpu.matmul %7, %9, %cst {dimension_numbers = #tpu.dot_dimension_numbers<[1], [0], [0], [1], [0, 0, 1, 1], [], []>} : vector<8x256xf32>, vector<256x256xf32>, vector<8x256xf32> -> vector<8x256xf32>
      %11 = arith.index_cast %6 : i32 to index
      %c0_7 = arith.constant 0 : index
      %c0_8 = arith.constant 0 : index
      %12 = vector.load %arg4[%11, %c0_7, %c0_8] : memref<1x1x256xf32, #tpu.memory_space<vmem>>, vector<1x1x256xf32>
      %13 = vector.shape_cast %12 : vector<1x1x256xf32> to vector<1x256xf32>
      %14 = vector.broadcast %13 : vector<1x256xf32> to vector<8x256xf32>
      %15 = arith.addf %10, %14 : vector<8x256xf32>
      %cst_9 = arith.constant 0.000000e+00 : f32
      %16 = vector.broadcast %cst_9 : f32 to vector<8x256xf32>
      %17 = arith.maximumf %15, %16 : vector<8x256xf32>
      %18 = arith.index_cast %6 : i32 to index
      %c0_10 = arith.constant 0 : index
      %c0_11 = arith.constant 0 : index
      %19 = vector.load %arg8[%18, %c0_10, %c0_11] : memref<1x8x256xf32, #tpu.memory_space<vmem>>, vector<1x8x256xf32>
      %20 = vector.shape_cast %19 : vector<1x8x256xf32> to vector<8x256xf32>
      %21 = vector.shape_cast %17 : vector<8x256xf32> to vector<1x8x256xf32>
      tpu.vector_store %arg8[%18, %c0_10, %c0_11], %21 {strides = array<i32>} : memref<1x8x256xf32, #tpu.memory_space<vmem>>, vector<1x8x256xf32>,
    } else {
    }
    %c1_i32_0 = arith.constant 1 : i32
    %3 = arith.cmpi sge, %arg1, %c1_i32_0 : i32
    %4 = arith.extui %3 : i1 to i32
    %c0_i32_1 = arith.constant 0 : i32
    %5 = arith.cmpi ne, %4, %c0_i32_1 : i32
    scf.if %5 {
      %c1_i32_2 = arith.constant 1 : i32
      %6 = arith.subi %arg1, %c1_i32_2 : i32
      %c0_i32_3 = arith.constant 0 : i32
      %7 = arith.maxsi %6, %c0_i32_3 : i32
      %c0 = arith.constant 0 : index
      %c0_4 = arith.constant 0 : index
      %c0_5 = arith.constant 0 : index
      %8 = vector.load %arg8[%c0, %c0_4, %c0_5] : memref<1x8x256xf32, #tpu.memory_space<vmem>>, vector<1x8x256xf32>
      %9 = vector.shape_cast %8 : vector<1x8x256xf32> to vector<8x256xf32>
      %c0_6 = arith.constant 0 : index
      %c0_7 = arith.constant 0 : index
      %10 = vector.load %arg5[%c0_6, %c0_7] : memref<256x256xf32, #tpu.memory_space<vmem>>, vector<256x256xf32>
      %cst = arith.constant dense<0.000000e+00> : vector<8x256xf32>
      %11 = tpu.matmul %9, %10, %cst {dimension_numbers = #tpu.dot_dimension_numbers<[1], [0], [0], [1], [0, 0, 1, 1], [], []>} : vector<8x256xf32>, vector<256x256xf32>, vector<8x256xf32> -> vector<8x256xf32>
      %12 = arith.index_cast %7 : i32 to index
      %c0_8 = arith.constant 0 : index
      %c0_9 = arith.constant 0 : index
      %13 = vector.load %arg6[%12, %c0_8, %c0_9] : memref<1x1x256xf32, #tpu.memory_space<vmem>>, vector<1x1x256xf32>
      %14 = vector.shape_cast %13 : vector<1x1x256xf32> to vector<1x256xf32>
      %15 = vector.broadcast %14 : vector<1x256xf32> to vector<8x256xf32>
      %16 = arith.addf %11, %15 : vector<8x256xf32>
      %cst_10 = arith.constant 0.000000e+00 : f32
      %17 = vector.broadcast %cst_10 : f32 to vector<8x256xf32>
      %18 = arith.maximumf %16, %17 : vector<8x256xf32>
      %c0_11 = arith.constant 0 : index
      %c0_12 = arith.constant 0 : index
      %19 = vector.load %arg7[%c0_11, %c0_12] : memref<8x256xf32, #tpu.memory_space<vmem>>, vector<8x256xf32>
      tpu.vector_store %arg7[%c0_11, %c0_12], %18 {strides = array<i32>} : memref<8x256xf32, #tpu.memory_space<vmem>>, vector<8x256xf32>,
    } else {
    }
    return
  }
  func.func @transform_0(%arg0: i32, %arg1: i32) -> (i32, i32) {
    %c0_i32 = arith.constant 0 : i32
    %c0_i32_0 = arith.constant 0 : i32
    %c0_i32_1 = arith.constant 0 : i32
    return %c0_i32, %c0_i32_0 : i32, i32
  }
  func.func @transform_1(%arg0: i32, %arg1: i32) -> (i32, i32, i32) {
    %c0_i32 = arith.constant 0 : i32
    %c0_i32_0 = arith.constant 0 : i32
    %c0_i32_1 = arith.constant 0 : i32
    %c0_i32_2 = arith.constant 0 : i32
    return %c0_i32, %c0_i32_0, %c0_i32_1 : i32, i32, i32
  }
  func.func @transform_2(%arg0: i32, %arg1: i32) -> (i32, i32, i32) {
    %c0_i32 = arith.constant 0 : i32
    %c0_i32_0 = arith.constant 0 : i32
    %c0_i32_1 = arith.constant 0 : i32
    %c0_i32_2 = arith.constant 0 : i32
    return %c0_i32, %c0_i32_0, %c0_i32_1 : i32, i32, i32
  }
  func.func @transform_3(%arg0: i32, %arg1: i32) -> (i32, i32) {
    %c0_i32 = arith.constant 0 : i32
    %c0_i32_0 = arith.constant 0 : i32
    %c0_i32_1 = arith.constant 0 : i32
    return %c0_i32, %c0_i32_0 : i32, i32
  }
  func.func @transform_4(%arg0: i32, %arg1: i32) -> (i32, i32, i32) {
    %c0_i32 = arith.constant 0 : i32
    %c0_i32_0 = arith.constant 0 : i32
    %c0_i32_1 = arith.constant 0 : i32
    %c0_i32_2 = arith.constant 0 : i32
    return %c0_i32, %c0_i32_0, %c0_i32_1 : i32, i32, i32
  }
  func.func @transform_5(%arg0: i32, %arg1: i32) -> (i32, i32) {
    %c0_i32 = arith.constant 0 : i32
    %c0_i32_0 = arith.constant 0 : i32
    return %arg0, %c0_i32 : i32, i32
  }
}

</mosaic_0001>

<bundles_post_ra>
// kernel: tpu_custom_call.1
= control target key start
LH: loop header
LB: loop body
LE: loop exit
PB: predicated region body
PF: predicated region fallthrough
CT: control target
= control target key end

     0   :  { %10 = vsyncpa [#allocation4], 0  ;;  %s1115_s0 = inlined_call_operand.hbm [shape: f32[8,256], index: 0, kind: input, shape index: {}]   ;;  %s1116_s1 = inlined_call_operand.hbm [shape: f32[1,256,256], index: 1, kind: input, shape index: {}]   ;;  %s1117_s2 = inlined_call_operand.hbm [shape: f32[1,1,256], index: 2, kind: input, shape index: {}]   ;;  %s1118_s3 = inlined_call_operand.hbm [shape: f32[256,256], index: 3, kind: input, shape index: {}]   ;;  %s1119_s4 = inlined_call_operand.vmem [shape: f32[1,1,256], index: 4, kind: input, shape index: {}]   ;;  %s1120_s5 = inlined_call_operand.hbm [shape: f32[8,256], index: 5, kind: output, shape index: {}]  }
   0x1   :  { %11 = vsyncpa [#allocation7], 0 }
   0x2   :  { %12 = vsyncpa [#allocation10], 0 }
   0x3   :  { %13 = vsyncpa [#allocation5], 0  ;;  %s1020_s18 = smov 0   ;;  %s1022_s19 = smov 0  }
   0x4   :  { %s1024_s20 = smov 0  }
   0x5 LB: > { %s190_s23 = sshll.u32 %s1116_s1, 4  ;;  %s699_s24 = sadd.s32 4294967295, %s981_s20   ;;  %s981_s20 = sphi %s1024_s20, %s19_s20   ;;  %s977_s19 = sphi %s1022_s19, %s1125_s19   ;;  %s973_s18 = sphi %s1020_s18, %s1124_s18   ;;  %s191_s23 = int_to_ptr.hbm [resolvable:$true] %s190_s23 }
   0x6   : > { %p700_p0 = scmp.ge.s32.totalorder %s981_s20, 1  ;;  %p167_p1 = scmp.lt.s32.totalorder %s981_s20, 3 }
   0x7   : > { %p1043_p2 = scmp.eq.s32.totalorder %s699_s24, 0  ;;  %s983_s27 = smov [#allocation6]  }
   0x8   : > { %p1047_p3 = pnand %p700_p0, %p167_p1  ;;  %s192_s28 = sshll.u32 %s983_s27, 4  ;;  %s193_s28 = int_to_ptr.vmem [resolvable:$true] %s192_s28 }
   0x9   : > { %s28_s30 = sadd.s32 1, %s977_s19  ;;  %s984_s6 = smov 256  }
   0xa   : > { %p741_p4 = pneg %p1047_p3  ;;  %p29_p6 = scmp.ge.s32.totalorder %s28_s30, 2 }
   0xb   : > { %s985_s7 = smov 16   ;;  %s179_s10 = sshll.u32 %s1115_s0, 4  ;;  %s180_s10 = int_to_ptr.hbm [resolvable:$true] %s179_s10 }
   0xc   : > { %p1055_p5 = pnand %p1043_p2, %p741_p4  ;;  %s1127_s30 = smov (%p29_p6, %s28_s30), 0 }
   0xd   : > { %s986_s11 = smov [#allocation3]   ;;  %s205_s15 = sshll.u32 %s1117_s2, 4  ;;  %s206_s15 = int_to_ptr.hbm [resolvable:$true] %s205_s15 }
   0xe   : > { %747 = dma.hbm_to_vmem [thread:$0]  (!%p1055_p5), %s191_s23, 8192, %s193_s28, [#allocation7], %s984_s6, %s984_s6, %s985_s7  }
   0xf   : > { %s181_s12 = sshll.u32 %s986_s11, 4  ;;  %s987_s16 = smov [#allocation8]   ;;  %s182_s12 = int_to_ptr.vmem [resolvable:$true] %s181_s12 }
  0x10   : > { %744 = dma.hbm_to_vmem [thread:$0]  (!%p1055_p5), %s180_s10, 256, %s182_s12, [#allocation4]  }
  0x11   : > { %s207_s17 = sshll.u32 %s987_s16, 4  ;;  %s216_s23 = sshll.u32 %s1118_s3, 4  ;;  %s208_s17 = int_to_ptr.vmem [resolvable:$true] %s207_s17  ;;  %s217_s23 = int_to_ptr.hbm [resolvable:$true] %s216_s23 }
  0x12   : > { %750 = dma.hbm_to_vmem [thread:$0]  (!%p1055_p5), %s206_s15, 32, %s208_s17, [#allocation7]  }
  0x13   : > { %s988_s27 = smov [#allocation9]   ;;  %237 = sbr.rel (%p1047_p3) target bundleno = 391 (0x187), region = 40 }
  0x14   : > { %s218_s28 = sshll.u32 %s988_s27, 4  ;;  %s219_s28 = int_to_ptr.vmem [resolvable:$true] %s218_s28 }
  0x15   : > { %753 = dma.hbm_to_vmem [thread:$0]  (!%p1055_p5), %s217_s23, 8192, %s219_s28, [#allocation10], %s984_s6, %s984_s6, %s985_s7  }
  0x18   : > { %956 = dma.done.wait (%p1043_p2), [#allocation4], 256  }
  0x19   : > { %958 = vsyncadd (%p1043_p2), [#allocation4], 4294967040 }
  0x1a   : > { %960 = dma.done.wait (%p1043_p2), [#allocation7], 8224  }
  0x1b   : > { %962 = vsyncadd (%p1043_p2), [#allocation7], 4294959072 }
  0x1c   : > { %964 = dma.done.wait (%p1043_p2), [#allocation10], 8192  }
  0x1d   : > { %966 = vsyncadd (%p1043_p2), [#allocation10], 4294959104  ;;  %p710_p7 = scmp.ge.s32.totalorder %s973_s18, 1 }
  0x1e   : > { %p275_p8 = scmp.lt.s32.totalorder (!%p710_p7), %s973_s18, 0 }
  0x1f   : > { %274 = sbr.rel (%p710_p7) target bundleno = 207 (0xcf), region = 60 }
  0x24   : > { %v310_v0 = vld [vmem:[#allocation6 + $0xf8] sm:$0xff]  ;;  %v308_v1 = vld [vmem:[#allocation6 + $0xe8] sm:$0xff]  ;;  %v309_v4 = vld [vmem:[#allocation6 + $0xf0] sm:$0xff]  ;;  %s276_s25 = scalar_select %p275_p8, %s973_s18, 0 }
  0x25   : > { %v342_v2 = vld [vmem:[#allocation6 + $0x1f8] sm:$0xff]  ;;  %391 = vmatpush.msra.mxu2 %v310_v0  ;;  %v340_v3 = vld [vmem:[#allocation6 + $0x1e8] sm:$0xff]  ;;  %351 = vmatpush.msra.mxu0 %v309_v4  ;;  %v307_v7 = vld [vmem:[#allocation6 + $0xe0] sm:$0xff] }
  0x26   : > { %411 = vmatpush.msra.mxu3 %v342_v2  ;;  %v306_v5 = vld [vmem:[#allocation6 + $0xd8] sm:$0xff]  ;;  %v304_v8 = vld [vmem:[#allocation6 + $0xc8] sm:$0xff]  ;;  %v341_v9 = vld [vmem:[#allocation6 + $0x1f0] sm:$0xff]  ;;  %s711_s26 = sshll.u32 %s276_s25, 1  ;;  %s720_s6 = sshll.u32 %s276_s25, 4 }
  0x27   : > { %v338_v6 = vld [vmem:[#allocation6 + $0x1d8] sm:$0xff]  ;;  %392 = vmatpush.msra.mxu2 %v308_v1  ;;  %352 = vmatpush.msra.mxu0 %v307_v7  ;;  %v336_v10 = vld [vmem:[#allocation6 + $0x1c8] sm:$0xff]  ;;  %v305_v11 = vld [vmem:[#allocation6 + $0xd0] sm:$0xff]  ;;  %s344_s29 = scalar_lea.vmem [#allocation8], %s711_s26  ;;  %s434_s7 = scalar_lea.vmem [#allocation2], %s720_s6 }
  0x28   : > { %412 = vmatpush.msra.mxu3 %v340_v3  ;;  %371 = vmatpush.msra.mxu1 %v341_v9  ;;  %v339_v12 = vld [vmem:[#allocation6 + $0x1e0] sm:$0xff]  ;;  %v337_v14 = vld [vmem:[#allocation6 + $0x1d0] sm:$0xff]  ;;  %v302_v15 = vld [vmem:[#allocation6 + $0xb8] sm:$0xff] }
  0x29   : > { %393 = vmatpush.msra.mxu2 %v306_v5  ;;  %v303_v13 = vld [vmem:[#allocation6 + $0xc0] sm:$0xff]  ;;  %353 = vmatpush.msra.mxu0 %v305_v11  ;;  %v334_v16 = vld [vmem:[#allocation6 + $0x1b8] sm:$0xff]  ;;  %v301_v17 = vld [vmem:[#allocation6 + $0xb0] sm:$0xff] }
  0x2a   : > { %413 = vmatpush.msra.mxu3 %v338_v6  ;;  %372 = vmatpush.msra.mxu1 %v339_v12  ;;  %v335_v18 = vld [vmem:[#allocation6 + $0x1c0] sm:$0xff]  ;;  %v300_v19 = vld [vmem:[#allocation6 + $0xa8] sm:$0xff]  ;;  %v333_v22 = vld [vmem:[#allocation6 + $0x1b0] sm:$0xff] }
  0x2b   : > { %394 = vmatpush.msra.mxu2 %v304_v8  ;;  %354 = vmatpush.msra.mxu0 %v303_v13  ;;  %v332_v20 = vld [vmem:[#allocation6 + $0x1a8] sm:$0xff]  ;;  %v299_v21 = vld [vmem:[#allocation6 + $0xa0] sm:$0xff]  ;;  %v298_v23 = vld [vmem:[#allocation6 + $0x98] sm:$0xff] }
  0x2c   : > { %414 = vmatpush.msra.mxu3 %v336_v10  ;;  %373 = vmatpush.msra.mxu1 %v337_v14  ;;  %v330_v24 = vld [vmem:[#allocation6 + $0x198] sm:$0xff]  ;;  %v297_v25 = vld [vmem:[#allocation6 + $0x90] sm:$0xff]  ;;  %v331_v26 = vld [vmem:[#allocation6 + $0x1a0] sm:$0xff] }
  0x2d   : > { %395 = vmatpush.msra.mxu2 %v302_v15  ;;  %355 = vmatpush.msra.mxu0 %v301_v17  ;;  %v296_v27 = vld [vmem:[#allocation6 + $0x88] sm:$0xff]  ;;  %v295_v29 = vld [vmem:[#allocation6 + $0x80] sm:$0xff]  ;;  %v329_v30 = vld [vmem:[#allocation6 + $0x190] sm:$0xff] }
  0x2e   : > { %415 = vmatpush.msra.mxu3 %v334_v16  ;;  %374 = vmatpush.msra.mxu1 %v335_v18  ;;  %v328_v28 = vld [vmem:[#allocation6 + $0x188] sm:$0xff]  ;;  %v294_v31 = vld [vmem:[#allocation6 + $0x78] sm:$0xff]  ;;  %v293_v33 = vld [vmem:[#allocation6 + $0x70] sm:$0xff] }
  0x2f   : > { %396 = vmatpush.msra.mxu2 %v300_v19  ;;  %356 = vmatpush.msra.mxu0 %v299_v21  ;;  %v326_v32 = vld [vmem:[#allocation6 + $0x178] sm:$0xff]  ;;  %v327_v34 = vld [vmem:[#allocation6 + $0x180] sm:$0xff]  ;;  %v292_v35 = vld [vmem:[#allocation6 + $0x68] sm:$0xff] }
  0x30   : > { %416 = vmatpush.msra.mxu3 %v332_v20  ;;  %375 = vmatpush.msra.mxu1 %v333_v22  ;;  %v324_v36 = vld [vmem:[#allocation6 + $0x168] sm:$0xff]  ;;  %v291_v37 = vld [vmem:[#allocation6 + $0x60] sm:$0xff]  ;;  %v325_v38 = vld [vmem:[#allocation6 + $0x170] sm:$0xff] }
  0x31   : > { %397 = vmatpush.msra.mxu2 %v298_v23  ;;  %357 = vmatpush.msra.mxu0 %v297_v25  ;;  %v290_v39 = vld [vmem:[#allocation6 + $0x58] sm:$0xff]  ;;  %v289_v41 = vld [vmem:[#allocation6 + $0x50] sm:$0xff]  ;;  %v323_v42 = vld [vmem:[#allocation6 + $0x160] sm:$0xff] }
  0x32   : > { %417 = vmatpush.msra.mxu3 %v330_v24  ;;  %376 = vmatpush.msra.mxu1 %v331_v26  ;;  %v322_v40 = vld [vmem:[#allocation6 + $0x158] sm:$0xff]  ;;  %v288_v43 = vld [vmem:[#allocation6 + $0x48] sm:$0xff]  ;;  %v287_v45 = vld [vmem:[#allocation6 + $0x40] sm:$0xff] }
  0x33   : > { %398 = vmatpush.msra.mxu2 %v296_v27  ;;  %358 = vmatpush.msra.mxu0 %v295_v29  ;;  %v320_v44 = vld [vmem:[#allocation6 + $0x148] sm:$0xff]  ;;  %v321_v46 = vld [vmem:[#allocation6 + $0x150] sm:$0xff]  ;;  %v286_v47 = vld [vmem:[#allocation6 + $0x38] sm:$0xff] }
  0x34   : > { %418 = vmatpush.msra.mxu3 %v328_v28  ;;  %377 = vmatpush.msra.mxu1 %v329_v30  ;;  %v318_v48 = vld [vmem:[#allocation6 + $0x138] sm:$0xff]  ;;  %v285_v49 = vld [vmem:[#allocation6 + $0x30] sm:$0xff]  ;;  %v319_v50 = vld [vmem:[#allocation6 + $0x140] sm:$0xff] }
  0x35   : > { %399 = vmatpush.msra.mxu2 %v294_v31  ;;  %359 = vmatpush.msra.mxu0 %v293_v33  ;;  %v284_v51 = vld [vmem:[#allocation6 + $0x28] sm:$0xff]  ;;  %v283_v53 = vld [vmem:[#allocation6 + $0x20] sm:$0xff]  ;;  %v317_v54 = vld [vmem:[#allocation6 + $0x130] sm:$0xff] }
  0x36   : > { %419 = vmatpush.msra.mxu3 %v326_v32  ;;  %378 = vmatpush.msra.mxu1 %v327_v34  ;;  %v316_v52 = vld [vmem:[#allocation6 + $0x128] sm:$0xff]  ;;  %v282_v55 = vld [vmem:[#allocation6 + $0x18] sm:$0xff]  ;;  %v281_v57 = vld [vmem:[#allocation6 + $0x10] sm:$0xff] }
  0x37   : > { %400 = vmatpush.msra.mxu2 %v292_v35  ;;  %360 = vmatpush.msra.mxu0 %v291_v37  ;;  %v314_v56 = vld [vmem:[#allocation6 + $0x118] sm:$0xff]  ;;  %v315_v58 = vld [vmem:[#allocation6 + $0x120] sm:$0xff]  ;;  %v280_v59 = vld [vmem:[#allocation6 + $0x8] sm:$0xff] }
  0x38   : > { %420 = vmatpush.msra.mxu3 %v324_v36  ;;  %379 = vmatpush.msra.mxu1 %v325_v38  ;;  %v312_v60 = vld [vmem:[#allocation6 + $0x108] sm:$0xff]  ;;  %v277_v61 = vld [vmem:[#allocation3] sm:$0xff]  ;;  %v278_v62 = vld [vmem:[#allocation3 + $0x8] sm:$0xff] }
  0x39   : > { %401 = vmatpush.msra.mxu2 %v290_v39  ;;  %361 = vmatpush.msra.mxu0 %v289_v41  ;;  %v279_v63 = vld [vmem:[#allocation6] sm:$0xff]  ;;  %v313_v0 = vld [vmem:[#allocation6 + $0x110] sm:$0xff] }
  0x3a   : > { %421 = vmatpush.msra.mxu3 %v322_v40  ;;  %380 = vmatpush.msra.mxu1 %v323_v42  ;;  %v311_v1 = vld [vmem:[#allocation6 + $0x100] sm:$0xff] }
  0x3b   : > { %402 = vmatpush.msra.mxu2 %v288_v43  ;;  %362 = vmatpush.msra.mxu0 %v287_v45  ;;  %v345_v2 = vld [vmem:[%s344_s29] sm:$0x3] }
  0x3c   : > { %422 = vmatpush.msra.mxu3 %v320_v44  ;;  %381 = vmatpush.msra.mxu1 %v321_v46  ;;  %v347_v3 = vperm.slane %v345_v2, 0  ;;  %v348_v6 = vperm.slane %v345_v2, 1 }
  0x3d   : > { %403 = vmatpush.msra.mxu2 %v286_v47  ;;  %363 = vmatpush.msra.mxu0 %v285_v49 }
  0x3e   : > { %423 = vmatpush.msra.mxu3 %v318_v48  ;;  %382 = vmatpush.msra.mxu1 %v319_v50 }
  0x3f   : > { %404 = vmatpush.msra.mxu2 %v284_v51  ;;  %364 = vmatpush.msra.mxu0 %v283_v53 }
  0x40   : > { %424 = vmatpush.msra.mxu3 %v316_v52  ;;  %383 = vmatpush.msra.mxu1 %v317_v54 }
  0x41   : > { %405 = vmatpush.msra.mxu2 %v282_v55  ;;  %365 = vmatpush.msra.mxu0 %v281_v57 }
  0x42   : > { %425 = vmatpush.msra.mxu3 %v314_v56  ;;  %384 = vmatpush.msra.mxu1 %v315_v58 }
  0x43   : > { %406 = vmatpush.msra.mxu2 %v280_v59  ;;  %366 = vmatpush.msra.mxu0 %v279_v63 }
  0x44   : > { %426 = vmatpush.msra.mxu3 %v312_v60  ;;  %407 = vmatmul.f32.vlgmr.msra.gmra.mxu2 %v277_v61 }
  0x45   : > { %427 = vmatmul.f32.vlgmr.msra.gmra.mxu3 %v278_v62  ;;  %385 = vmatpush.msra.mxu1 %v313_v0 }
  0x46   : > { %367 = vmatmul.f32.vlgmr.msra.gmra.mxu0 %v277_v61 }
  0x47   : > { %386 = vmatpush.msra.mxu1 %v311_v1 }
  0x48   : > { %387 = vmatmul.f32.vlgmr.msra.gmra.mxu1 %v278_v62 }
  0xc3   : > { %v368_v4 = vpop.f32.mrf.mxu0 }
  0xc4   : > { %v369_v5 = vadd.f32 %v368_v4, %v347_v3 }
  0xc5   : > { %v388_v7 = vpop.f32.mrf.mxu1 }
  0xc6   : > { %v389_v8 = vadd.f32 %v388_v7, %v369_v5 }
  0xc7   : > { %v408_v9 = vpop.f32.mrf.mxu2 }
  0xc8   : > { %v428_v10 = vpop.f32.mrf.mxu3  ;;  %v409_v11 = vadd.f32 %v408_v9, %v348_v6  ;;  %v431_v12 = vmax.f32 %v389_v8, 0.0 }
  0xca   : > { %435 = vst [vmem:[%s434_s7] sm:$0xff] %v431_v12  ;;  %v429_v13 = vadd.f32 %v428_v10, %v409_v11 }
  0xcc   : > { %v432_v14 = vmax.f32 %v429_v13, 0.0 }
  0xce   : > { %436 = vst [vmem:[%s434_s7 + $0x8] sm:$0xff] %v432_v14 }
  0xcf PF: > { %p713_p9 = scmp.lt.s32.totalorder %s973_s18, 1 }
  0xd0   : > { %s714_s8 = sadd.s32 (!%p713_p9), 4294967295, %s973_s18 }
  0xd1   : > { %440 = sbr.rel (%p713_p9) target bundleno = 385 (0x181), region = 64  ;;  %p442_p10 = scmp.gt.s32.totalorder (!%p713_p9), %s714_s8, 0 }
  0xd6   : > { %v477_v15 = vld [vmem:[#allocation9 + $0xf8] sm:$0xff]  ;;  %v475_v16 = vld [vmem:[#allocation9 + $0xe8] sm:$0xff]  ;;  %v476_v19 = vld [vmem:[#allocation9 + $0xf0] sm:$0xff]  ;;  %s1129_s8 = smov (!%p442_p10, %s714_s8), 0 }
  0xd7   : > { %v509_v17 = vld [vmem:[#allocation9 + $0x1f8] sm:$0xff]  ;;  %558 = vmatpush.msra.mxu2 %v477_v15  ;;  %v507_v18 = vld [vmem:[#allocation9 + $0x1e8] sm:$0xff]  ;;  %518 = vmatpush.msra.mxu0 %v476_v19  ;;  %v474_v22 = vld [vmem:[#allocation9 + $0xe0] sm:$0xff]  ;;  %s715_s9 = sshll.u32 %s1129_s8, 1 }
  0xd8   : > { %578 = vmatpush.msra.mxu3 %v509_v17  ;;  %v473_v20 = vld [vmem:[#allocation9 + $0xd8] sm:$0xff]  ;;  %v471_v23 = vld [vmem:[#allocation9 + $0xc8] sm:$0xff]  ;;  %v508_v24 = vld [vmem:[#allocation9 + $0x1f0] sm:$0xff]  ;;  %s511_s12 = scalar_lea.vmem %s1119_s4, %s715_s9 }
  0xd9   : > { %v505_v21 = vld [vmem:[#allocation9 + $0x1d8] sm:$0xff]  ;;  %559 = vmatpush.msra.mxu2 %v475_v16  ;;  %519 = vmatpush.msra.mxu0 %v474_v22  ;;  %v503_v25 = vld [vmem:[#allocation9 + $0x1c8] sm:$0xff]  ;;  %v472_v26 = vld [vmem:[#allocation9 + $0xd0] sm:$0xff] }
  0xda   : > { %579 = vmatpush.msra.mxu3 %v507_v18  ;;  %538 = vmatpush.msra.mxu1 %v508_v24  ;;  %v506_v27 = vld [vmem:[#allocation9 + $0x1e0] sm:$0xff]  ;;  %v504_v29 = vld [vmem:[#allocation9 + $0x1d0] sm:$0xff]  ;;  %v469_v30 = vld [vmem:[#allocation9 + $0xb8] sm:$0xff] }
  0xdb   : > { %560 = vmatpush.msra.mxu2 %v473_v20  ;;  %v470_v28 = vld [vmem:[#allocation9 + $0xc0] sm:$0xff]  ;;  %520 = vmatpush.msra.mxu0 %v472_v26  ;;  %v501_v31 = vld [vmem:[#allocation9 + $0x1b8] sm:$0xff]  ;;  %v468_v32 = vld [vmem:[#allocation9 + $0xb0] sm:$0xff] }
  0xdc   : > { %580 = vmatpush.msra.mxu3 %v505_v21  ;;  %539 = vmatpush.msra.mxu1 %v506_v27  ;;  %v502_v33 = vld [vmem:[#allocation9 + $0x1c0] sm:$0xff]  ;;  %v467_v34 = vld [vmem:[#allocation9 + $0xa8] sm:$0xff]  ;;  %v500_v37 = vld [vmem:[#allocation9 + $0x1b0] sm:$0xff] }
  0xdd   : > { %561 = vmatpush.msra.mxu2 %v471_v23  ;;  %521 = vmatpush.msra.mxu0 %v470_v28  ;;  %v499_v35 = vld [vmem:[#allocation9 + $0x1a8] sm:$0xff]  ;;  %v466_v36 = vld [vmem:[#allocation9 + $0xa0] sm:$0xff]  ;;  %v465_v38 = vld [vmem:[#allocation9 + $0x98] sm:$0xff] }
  0xde   : > { %581 = vmatpush.msra.mxu3 %v503_v25  ;;  %540 = vmatpush.msra.mxu1 %v504_v29  ;;  %v497_v39 = vld [vmem:[#allocation9 + $0x198] sm:$0xff]  ;;  %v464_v40 = vld [vmem:[#allocation9 + $0x90] sm:$0xff]  ;;  %v498_v41 = vld [vmem:[#allocation9 + $0x1a0] sm:$0xff] }
  0xdf   : > { %562 = vmatpush.msra.mxu2 %v469_v30  ;;  %522 = vmatpush.msra.mxu0 %v468_v32  ;;  %v463_v42 = vld [vmem:[#allocation9 + $0x88] sm:$0xff]  ;;  %v462_v44 = vld [vmem:[#allocation9 + $0x80] sm:$0xff]  ;;  %v496_v45 = vld [vmem:[#allocation9 + $0x190] sm:$0xff] }
  0xe0   : > { %582 = vmatpush.msra.mxu3 %v501_v31  ;;  %541 = vmatpush.msra.mxu1 %v502_v33  ;;  %v495_v43 = vld [vmem:[#allocation9 + $0x188] sm:$0xff]  ;;  %v461_v46 = vld [vmem:[#allocation9 + $0x78] sm:$0xff]  ;;  %v460_v48 = vld [vmem:[#allocation9 + $0x70] sm:$0xff] }
  0xe1   : > { %563 = vmatpush.msra.mxu2 %v467_v34  ;;  %523 = vmatpush.msra.mxu0 %v466_v36  ;;  %v493_v47 = vld [vmem:[#allocation9 + $0x178] sm:$0xff]  ;;  %v494_v49 = vld [vmem:[#allocation9 + $0x180] sm:$0xff]  ;;  %v459_v50 = vld [vmem:[#allocation9 + $0x68] sm:$0xff] }
  0xe2   : > { %583 = vmatpush.msra.mxu3 %v499_v35  ;;  %542 = vmatpush.msra.mxu1 %v500_v37  ;;  %v491_v51 = vld [vmem:[#allocation9 + $0x168] sm:$0xff]  ;;  %v458_v52 = vld [vmem:[#allocation9 + $0x60] sm:$0xff]  ;;  %v492_v53 = vld [vmem:[#allocation9 + $0x170] sm:$0xff] }
  0xe3   : > { %564 = vmatpush.msra.mxu2 %v465_v38  ;;  %524 = vmatpush.msra.mxu0 %v464_v40  ;;  %v457_v54 = vld [vmem:[#allocation9 + $0x58] sm:$0xff]  ;;  %v456_v56 = vld [vmem:[#allocation9 + $0x50] sm:$0xff]  ;;  %v490_v57 = vld [vmem:[#allocation9 + $0x160] sm:$0xff] }
  0xe4   : > { %584 = vmatpush.msra.mxu3 %v497_v39  ;;  %543 = vmatpush.msra.mxu1 %v498_v41  ;;  %v489_v55 = vld [vmem:[#allocation9 + $0x158] sm:$0xff]  ;;  %v455_v58 = vld [vmem:[#allocation9 + $0x48] sm:$0xff]  ;;  %v454_v60 = vld [vmem:[#allocation9 + $0x40] sm:$0xff] }
  0xe5   : > { %565 = vmatpush.msra.mxu2 %v463_v42  ;;  %525 = vmatpush.msra.mxu0 %v462_v44  ;;  %v487_v59 = vld [vmem:[#allocation9 + $0x148] sm:$0xff]  ;;  %v488_v61 = vld [vmem:[#allocation9 + $0x150] sm:$0xff]  ;;  %v453_v62 = vld [vmem:[#allocation9 + $0x38] sm:$0xff] }
  0xe6   : > { %585 = vmatpush.msra.mxu3 %v495_v43  ;;  %544 = vmatpush.msra.mxu1 %v496_v45  ;;  %v485_v63 = vld [vmem:[#allocation9 + $0x138] sm:$0xff]  ;;  %v452_v0 = vld [vmem:[#allocation9 + $0x30] sm:$0xff]  ;;  %v486_v1 = vld [vmem:[#allocation9 + $0x140] sm:$0xff] }
  0xe7   : > { %566 = vmatpush.msra.mxu2 %v461_v46  ;;  %526 = vmatpush.msra.mxu0 %v460_v48  ;;  %v451_v2 = vld [vmem:[#allocation9 + $0x28] sm:$0xff]  ;;  %v450_v4 = vld [vmem:[#allocation9 + $0x20] sm:$0xff]  ;;  %v484_v5 = vld [vmem:[#allocation9 + $0x130] sm:$0xff] }
  0xe8   : > { %586 = vmatpush.msra.mxu3 %v493_v47  ;;  %545 = vmatpush.msra.mxu1 %v494_v49  ;;  %v483_v3 = vld [vmem:[#allocation9 + $0x128] sm:$0xff]  ;;  %v449_v6 = vld [vmem:[#allocation9 + $0x18] sm:$0xff]  ;;  %v448_v8 = vld [vmem:[#allocation9 + $0x10] sm:$0xff] }
  0xe9   : > { %567 = vmatpush.msra.mxu2 %v459_v50  ;;  %527 = vmatpush.msra.mxu0 %v458_v52  ;;  %v481_v7 = vld [vmem:[#allocation9 + $0x118] sm:$0xff]  ;;  %v482_v9 = vld [vmem:[#allocation9 + $0x120] sm:$0xff]  ;;  %v447_v10 = vld [vmem:[#allocation9 + $0x8] sm:$0xff] }
  0xea   : > { %587 = vmatpush.msra.mxu3 %v491_v51  ;;  %546 = vmatpush.msra.mxu1 %v492_v53  ;;  %v479_v11 = vld [vmem:[#allocation9 + $0x108] sm:$0xff]  ;;  %v444_v12 = vld [vmem:[#allocation2] sm:$0xff]  ;;  %v480_v15 = vld [vmem:[#allocation9 + $0x110] sm:$0xff] }
  0xeb   : > { %568 = vmatpush.msra.mxu2 %v457_v54  ;;  %528 = vmatpush.msra.mxu0 %v456_v56  ;;  %v445_v13 = vld [vmem:[#allocation2 + $0x8] sm:$0xff]  ;;  %v512_v17 = vld [vmem:[%s511_s12] sm:$0x3] }
  0xec   : > { %588 = vmatpush.msra.mxu3 %v489_v55  ;;  %547 = vmatpush.msra.mxu1 %v490_v57  ;;  %v446_v14 = vld [vmem:[#allocation9] sm:$0xff]  ;;  %v514_v18 = vperm.slane %v512_v17, 0  ;;  %v515_v21 = vperm.slane %v512_v17, 1 }
  0xed   : > { %569 = vmatpush.msra.mxu2 %v455_v58  ;;  %529 = vmatpush.msra.mxu0 %v454_v60  ;;  %v478_v16 = vld [vmem:[#allocation9 + $0x100] sm:$0xff] }
  0xee   : > { %589 = vmatpush.msra.mxu3 %v487_v59  ;;  %548 = vmatpush.msra.mxu1 %v488_v61 }
  0xef   : > { %570 = vmatpush.msra.mxu2 %v453_v62  ;;  %530 = vmatpush.msra.mxu0 %v452_v0 }
  0xf0   : > { %590 = vmatpush.msra.mxu3 %v485_v63  ;;  %549 = vmatpush.msra.mxu1 %v486_v1 }
  0xf1   : > { %571 = vmatpush.msra.mxu2 %v451_v2  ;;  %531 = vmatpush.msra.mxu0 %v450_v4 }
  0xf2   : > { %591 = vmatpush.msra.mxu3 %v483_v3  ;;  %550 = vmatpush.msra.mxu1 %v484_v5 }
  0xf3   : > { %572 = vmatpush.msra.mxu2 %v449_v6  ;;  %532 = vmatpush.msra.mxu0 %v448_v8 }
  0xf4   : > { %592 = vmatpush.msra.mxu3 %v481_v7  ;;  %551 = vmatpush.msra.mxu1 %v482_v9 }
  0xf5   : > { %573 = vmatpush.msra.mxu2 %v447_v10  ;;  %533 = vmatpush.msra.mxu0 %v446_v14 }
  0xf6   : > { %593 = vmatpush.msra.mxu3 %v479_v11  ;;  %574 = vmatmul.f32.vlgmr.msra.gmra.mxu2 %v444_v12 }
  0xf7   : > { %594 = vmatmul.f32.vlgmr.msra.gmra.mxu3 %v445_v13  ;;  %552 = vmatpush.msra.mxu1 %v480_v15 }
  0xf8   : > { %534 = vmatmul.f32.vlgmr.msra.gmra.mxu0 %v444_v12 }
  0xf9   : > { %553 = vmatpush.msra.mxu1 %v478_v16 }
  0xfa   : > { %554 = vmatmul.f32.vlgmr.msra.gmra.mxu1 %v445_v13 }
 0x175   : > { %v535_v19 = vpop.f32.mrf.mxu0 }
 0x176   : > { %v536_v20 = vadd.f32 %v535_v19, %v514_v18 }
 0x177   : > { %v555_v22 = vpop.f32.mrf.mxu1 }
 0x178   : > { %v556_v23 = vadd.f32 %v555_v22, %v536_v20 }
 0x179   : > { %v575_v24 = vpop.f32.mrf.mxu2 }
 0x17a   : > { %v595_v25 = vpop.f32.mrf.mxu3  ;;  %v576_v26 = vadd.f32 %v575_v24, %v515_v21  ;;  %v598_v27 = vmax.f32 %v556_v23, 0.0 }
 0x17c   : > { %600 = vst [vmem:[#allocation11] sm:$0xff] %v598_v27  ;;  %v596_v28 = vadd.f32 %v595_v25, %v576_v26 }
 0x17e   : > { %v599_v29 = vmax.f32 %v596_v28, 0.0 }
 0x180   : > { %601 = vst [vmem:[#allocation11 + $0x8] sm:$0xff] %v599_v29 }
 0x181 PF: > { %p762_p11 = scmp.eq.s32.totalorder %s699_s24, 1  ;;  %s613_s14 = sshll.u32 %s1120_s5, 4  ;;  %s614_s14 = int_to_ptr.hbm [resolvable:$true] %s613_s14 }
 0x182   : > { %s989_s15 = smov [#allocation11]  }
 0x183   : > { %s611_s16 = sshll.u32 %s989_s15, 4  ;;  %s612_s16 = int_to_ptr.vmem [resolvable:$true] %s611_s16 }
 0x184   : > { %738 = dma.vmem_to_hbm [thread:$0]  (%p762_p11), %s612_s16, 256, %s614_s14, [#allocation5]  }
 0x185   : > { %968 = dma.done.wait (%p762_p11), [#allocation5], 256  }
 0x186   : > { %970 = vsyncadd (%p762_p11), [#allocation5], 4294967040 }
 0x187 PF: > { %s19_s20 = sadd.s32 1, %s981_s20   ;;  %s1124_s18 = smov %s977_s19 }
 0x188   : > { %p16_p12 = scmp.ge.s32.totalorder %s19_s20, 4   ;;  %s1125_s19 = smov %s1127_s30 }
 0x18a   :  { %18 = sbr.rel (!%p16_p12) target bundleno = 5 (0x5), region = 93 }
 0x18f   :  { %627 = vsyncpa [#allocation4], 1 }
 0x190   :  { %629 = vsyncpa [#allocation4 + $0x1], 1 }
 0x191   :  { %630 = vsyncpa [#allocation7], 1 }
 0x192   :  { %631 = vsyncpa [#allocation10], 1 }
 0x193   :  { %632 = vsyncpa [#allocation5], 1 }
 0x194   :  { %634 = vsyncpa [#allocation5 + $0x1], 1 }

</bundles_post_ra>
